<compile_context>
chip_gen: v7x
topology: tpu7x:2x2x1
jax: 0.10.0
libtpu: 0.0.40
codegen_flags: <defaults>
</compile_context>

<pallas_src>
import functools

import jax
import jax.numpy as jnp
from jax import lax
from jax.experimental import pallas as pl
from jax.experimental.pallas import tpu as pltpu


# --------------------------------------------------------------------------
# Kernel
# --------------------------------------------------------------------------
def _rmsnorm_kernel(eps, inv_hidden, x_ref, w_ref, o_ref):
    # Matches the PyTorch reference exactly:
    #   variance = mean(x_f32 ** 2, -1, keepdim=True)
    #   x = x_f32 * rsqrt(variance + eps)
    #   out = weight * x.to(input_dtype)
    x_in = x_ref[...]
    x = x_in.astype(jnp.float32)
    ss = jnp.sum(x * x, axis=-1, keepdims=True)          # XLU cross-lane reduce
    normed = x * lax.rsqrt(ss * inv_hidden + eps)          # rsqrt on EUP
    # Cast back to the input dtype BEFORE the weight multiply (as in PyTorch).
    y = w_ref[...] * normed.astype(x_in.dtype)
    o_ref[...] = y.astype(o_ref.dtype)


# --------------------------------------------------------------------------
# Tile-size selection helpers
# --------------------------------------------------------------------------
def _round_up(x, m):
    return ((x + m - 1) // m) * m


def _round_down(x, m):
    return (x // m) * m


def _sublane_multiple(dtype):
    # Keep sublanes packed: f32 vreg is [8,128], bf16 [16,128], i8/fp8 [32,128].
    itemsize = jnp.dtype(dtype).itemsize
    return {4: 8, 2: 16, 1: 32}.get(itemsize, 8)


def _physical_vmem_bytes():
    # v5e / v6e: 128 MiB per TensorCore; v7x: 64 MiB per TensorCore.
    cap = 128 * 1024 * 1024
    try:
        kind = jax.devices()[0].device_kind.lower()
        if "v7" in kind or "7x" in kind:
            cap = 64 * 1024 * 1024
    except Exception:
        pass
    return cap


def _pick_tile_rows(rows, hidden, in_dtype, out_dtype, vmem_budget_bytes):
    """Biggest dtype-aligned row tile whose double-buffered pipeline fits the budget."""
    in_b = jnp.dtype(in_dtype).itemsize
    out_b = jnp.dtype(out_dtype).itemsize
    sublane = _sublane_multiple(in_dtype)
    # Per-row live VMEM: double-buffered input tile + double-buffered output
    # tile + ~3 f32 intermediates for the in-flight compute block.
    per_row = hidden * (2 * in_b + 2 * out_b + 3 * 4)
    tile = _round_down(max(vmem_budget_bytes // max(per_row, 1), sublane), sublane)
    tile = max(sublane, min(tile, 1024))  # bandwidth plateaus by ~512-1024 rows
    if tile >= rows:
        return rows  # single full block (block == full dim: no divisibility req)
    return tile


# --------------------------------------------------------------------------
# Public wrapper
# --------------------------------------------------------------------------
def yuan_rms_norm(hidden_states, weight, eps=1e-6, *, tile_rows=None):
    """hidden_states: (..., hidden); weight: (hidden,)."""
    orig_shape = hidden_states.shape
    hidden = orig_shape[-1]
    x2d = hidden_states.reshape(-1, hidden)
    rows = x2d.shape[0]

    # PyTorch: out = weight * normed.to(input_dtype)  -> promoted dtype.
    out_dtype = jnp.promote_types(weight.dtype, hidden_states.dtype)

    vmem_cap = _physical_vmem_bytes()
    sublane = _sublane_multiple(x2d.dtype)
    if tile_rows is None:
        # Use ~half of physical VMEM for the pipelined tiles; rest is headroom.
        tile_rows = _pick_tile_rows(rows, hidden, x2d.dtype, out_dtype, vmem_cap // 2)
    else:
        tile_rows = rows if tile_rows >= rows else max(
            sublane, _round_up(tile_rows, sublane))

    # No host-side pad/slice: Pallas masks the ragged last block and each
    # row's reduction is independent, so padded rows are harmless.
    # NOTE: peak throughput needs hidden % 128 == 0 (lane-dense stores);
    # narrower hidden still runs correctly with masked stores.
    grid = (pl.cdiv(rows, tile_rows),)
    w2d = weight.reshape(1, hidden)

    kernel = functools.partial(_rmsnorm_kernel, float(eps), 1.0 / float(hidden))

    out = pl.pallas_call(
        kernel,
        out_shape=jax.ShapeDtypeStruct((rows, hidden), out_dtype),
        grid_spec=pltpu.PrefetchScalarGridSpec(
            num_scalar_prefetch=0,
            grid=grid,
            in_specs=[
                pl.BlockSpec((tile_rows, hidden), lambda i: (i, 0)),
                pl.BlockSpec((1, hidden), lambda i: (0, 0)),  # resident weight
            ],
            out_specs=pl.BlockSpec((tile_rows, hidden), lambda i: (i, 0)),
        ),
        compiler_params=pltpu.CompilerParams(
            dimension_semantics=("parallel",),
            vmem_limit_bytes=int(min(vmem_cap * 3 // 4, 96 * 1024 * 1024)),
        ),
    )(x2d, w2d)

    return out.reshape(orig_shape)


# --------------------------------------------------------------------------
# Reference + self-test
# --------------------------------------------------------------------------
def _reference(hidden_states, weight, eps=1e-6):
    input_dtype = hidden_states.dtype
    x = hidden_states.astype(jnp.float32)
    variance = jnp.mean(x * x, axis=-1, keepdims=True)
    x = x * lax.rsqrt(variance + eps)
    return weight * x.astype(input_dtype)


if __name__ == "__main__":
    key = jax.random.PRNGKey(0)

    # Small shape consistent with the module: (batch=2, seq=8, hidden=32).
    batch, seq, hidden = 2, 8, 32
    x = jax.random.normal(key, (batch, seq, hidden), dtype=jnp.float32)
    weight = jnp.ones((hidden,), dtype=jnp.float32)  # nn.Parameter(torch.ones(hidden))

    out = jax.block_until_ready(yuan_rms_norm(x, weight, eps=1e-6))
    ref = _reference(x, weight, eps=1e-6)
    assert out.shape == x.shape
    assert jnp.allclose(out, ref, atol=1e-5, rtol=1e-5)

    # Ragged row count + small forced tile to exercise the masked
    # partial-last-block path (no host-side pad/slice).
    x2 = jax.random.normal(jax.random.PRNGKey(0), (1, 20, 256), dtype=jnp.float32)
    w2 = jax.random.normal(jax.random.PRNGKey(1), (256,), dtype=jnp.float32)
    out2 = jax.block_until_ready(yuan_rms_norm(x2, w2, eps=1e-6, tile_rows=8))
    ref2 = _reference(x2, w2, eps=1e-6)
    assert out2.shape == x2.shape
    assert jnp.allclose(out2, ref2, atol=1e-5, rtol=1e-5)

    print("KERNEL_OK")
</pallas_src>

<mosaic_0001>
module attributes {stable_mosaic.version = 11 : i64} {
  func.func @_rmsnorm_kernel(%arg0: i32, %arg1: memref<16x32xf32, #tpu.memory_space<vmem>>, %arg2: memref<1x32xf32, #tpu.memory_space<vmem>>, %arg3: memref<16x32xf32, #tpu.memory_space<vmem>>) attributes {dimension_semantics = [#tpu.dimension_semantics<parallel>], iteration_bounds = array<i64: 1>, scalar_prefetch = 0 : i64, scratch_operands = 0 : i64, tpu.core_type = #tpu.core_type<tc>, window_params = [{transform_indices = @transform_0, window_bounds = array<i64: 16, 32>}, {pipeline_mode = #tpu.pipeline_mode<synchronous>, transform_indices = @transform_1, window_bounds = array<i64: 1, 32>}, {transform_indices = @transform_2, window_bounds = array<i64: 16, 32>}]} {
    %c0 = arith.constant 0 : index
    %c0_0 = arith.constant 0 : index
    %0 = vector.load %arg1[%c0, %c0_0] : memref<16x32xf32, #tpu.memory_space<vmem>>, vector<16x32xf32>
    %1 = arith.mulf %0, %0 : vector<16x32xf32>
    %cst = arith.constant dense<0.000000e+00> : vector<16xf32>
    %2 = vector.multi_reduction <add>, %1, %cst [1] : vector<16x32xf32> to vector<16xf32>
    %3 = vector.shape_cast %2 : vector<16xf32> to vector<16x1xf32>
    %cst_1 = arith.constant 3.125000e-02 : f32
    %4 = vector.broadcast %cst_1 : f32 to vector<16x1xf32>
    %5 = arith.mulf %3, %4 : vector<16x1xf32>
    %cst_2 = arith.constant 9.99999997E-7 : f32
    %6 = vector.broadcast %cst_2 : f32 to vector<16x1xf32>
    %7 = arith.addf %5, %6 : vector<16x1xf32>
    %8 = math.rsqrt %7 : vector<16x1xf32>
    %9 = vector.broadcast %8 : vector<16x1xf32> to vector<16x32xf32>
    %10 = arith.mulf %0, %9 : vector<16x32xf32>
    %c0_3 = arith.constant 0 : index
    %c0_4 = arith.constant 0 : index
    %11 = vector.load %arg2[%c0_3, %c0_4] : memref<1x32xf32, #tpu.memory_space<vmem>>, vector<1x32xf32>
    %12 = vector.broadcast %11 : vector<1x32xf32> to vector<16x32xf32>
    %13 = arith.mulf %12, %10 : vector<16x32xf32>
    %c0_5 = arith.constant 0 : index
    %c0_6 = arith.constant 0 : index
    %14 = vector.load %arg3[%c0_5, %c0_6] : memref<16x32xf32, #tpu.memory_space<vmem>>, vector<16x32xf32>
    tpu.vector_store %arg3[%c0_5, %c0_6], %13 {strides = array<i32>} : memref<16x32xf32, #tpu.memory_space<vmem>>, vector<16x32xf32>,
    return
  }
  func.func @transform_0(%arg0: i32) -> (i32, i32) {
    %c0_i32 = arith.constant 0 : i32
    %c0_i32_0 = arith.constant 0 : i32
    return %arg0, %c0_i32 : i32, i32
  }
  func.func @transform_1(%arg0: i32) -> (i32, i32) {
    %c0_i32 = arith.constant 0 : i32
    %c0_i32_0 = arith.constant 0 : i32
    %c0_i32_1 = arith.constant 0 : i32
    return %c0_i32, %c0_i32_0 : i32, i32
  }
  func.func @transform_2(%arg0: i32) -> (i32, i32) {
    %c0_i32 = arith.constant 0 : i32
    %c0_i32_0 = arith.constant 0 : i32
    return %arg0, %c0_i32 : i32, i32
  }
}

</mosaic_0001>

<bundles_post_ra>
// kernel: tpu_custom_call.1
= control target key start
LH: loop header
LB: loop body
LE: loop exit
PB: predicated region body
PF: predicated region fallthrough
CT: control target
= control target key end

     0   :  { %7 = vsyncpa [#allocation3], 0  ;;  %s234_s0 = inlined_call_operand.hbm [shape: f32[16,32], index: 0, kind: input, shape index: {}]   ;;  %s235_s1 = inlined_call_operand.hbm [shape: f32[1,32], index: 1, kind: input, shape index: {}]   ;;  %s236_s2 = inlined_call_operand.hbm [shape: f32[16,32], index: 2, kind: output, shape index: {}]  }
   0x1   :  { %8 = vsyncpa [#allocation6], 0 }
   0x2   :  { %9 = vsyncpa [#allocation4], 0  ;;  %s168_s9 = smov [#allocation2]   ;;  %s96_s13 = scalar_lea.hbm %s234_s0, 256 }
   0x3   :  { %s15_s10 = sshll.u32 %s168_s9, 4  ;;  %p97_p0 = scmp.ne.s32.totalorder %s234_s0, %s96_s13  ;;  %s16_s10 = int_to_ptr.vmem [resolvable:$true] %s15_s10 }
   0x4   :  { %p100_p1 = scmp.lt.u32.totalorder %s96_s13, %s234_s0 }
   0x6   :  { %p102_p2 = pnand %p100_p1, %p97_p0 }
   0x8   :  { %105 = shalt.err (!%p102_p2)
}
   0x9   :  { %s106_s18 = scalar_lea.vmem %s16_s10, 256  ;;  %p111_p4 = scmp.lt.s32.totalorder %s16_s10, %s16_s10 }
   0xa   :  { %p107_p3 = scmp.ne.s32.totalorder %s16_s10, %s106_s18  ;;  %p112_p5 = scmp.lt.s32.totalorder %s106_s18, %s106_s18 }
   0xc   :  { %p113_p6 = por %p112_p5, %p111_p4 }
   0xe   :  { %p114_p7 = pnand %p113_p6, %p107_p3 }
  0x10   :  { %117 = shalt.err (!%p114_p7)
}
  0x11   :  { %s169_s19 = smov 128   ;;  %s170_s20 = smov 8  }
  0x12   :  { %21 = dma.hbm_to_vmem [thread:$0]  %s234_s0, 256, %s16_s10, [#allocation3], %s169_s19, %s169_s19, %s170_s20  }
  0x13   :  { %s171_s23 = smov [#allocation5]   ;;  %s118_s27 = scalar_lea.hbm %s235_s1, 16 }
  0x14   :  { %s28_s24 = sshll.u32 %s171_s23, 4  ;;  %p119_p8 = scmp.ne.s32.totalorder %s235_s1, %s118_s27  ;;  %s29_s24 = int_to_ptr.vmem [resolvable:$true] %s28_s24 }
  0x15   :  { %p122_p9 = scmp.lt.u32.totalorder %s118_s27, %s235_s1 }
  0x17   :  { %p124_p10 = pnand %p122_p9, %p119_p8 }
  0x19   :  { %127 = shalt.err (!%p124_p10)
}
  0x1a   :  { %s128_s4 = scalar_lea.vmem %s29_s24, 16  ;;  %s132_s0 = scalar_lea.vmem %s29_s24, 32 }
  0x1b   :  { %p129_p11 = scmp.ne.s32.totalorder %s29_s24, %s128_s4  ;;  %p133_p12 = scmp.lt.s32.totalorder %s29_s24, %s29_s24 }
  0x1c   :  { %p134_p13 = scmp.lt.s32.totalorder %s132_s0, %s128_s4 }
  0x1e   :  { %p135_p0 = por %p134_p13, %p133_p12 }
  0x20   :  { %p136_p1 = pnand %p135_p0, %p129_p11 }
  0x22   :  { %139 = shalt.err (!%p136_p1)
}
  0x23   :  { %31 = dma.hbm_to_vmem [thread:$0]  %s235_s1, 16, %s29_s24, [#allocation6]  }
  0x24   :  { %162 = dma.done.wait [#allocation3], 256  }
  0x25   :  { %163 = vsyncadd [#allocation3], 4294967040 }
  0x26   :  { %164 = dma.done.wait [#allocation6], 16  }
  0x27   :  { %165 = vsyncadd [#allocation6], 4294967280  ;;  %v38_v0 = vld [vmem:[#allocation2] sm:$0xff]  ;;  %vm42_vm0 = vcmask 261120   ;;  %v39_v1 = vld [vmem:[#allocation2 + $0x8] sm:$0xff]  ;;  %s172_s1 = smov [#allocation7]  }
  0x28   :  { %v40_v2 = vmul.f32 %v38_v0, %v38_v0  ;;  %v41_v3 = vmul.f32 %v39_v1, %v39_v1  ;;  %v86_v13 = vld [vmem:[#allocation5] ss:$0 sm:$0xff]  ;;  %s73_s7 = sshll.u32 %s172_s1, 4  ;;  %s74_s7 = int_to_ptr.vmem [resolvable:$true] %s73_s7 }
  0x29   :  { %s140_s8 = scalar_lea.vmem %s74_s7, 256  ;;  %p145_p3 = scmp.lt.s32.totalorder %s74_s7, %s74_s7 }
  0x2a   :  { %v43_v4 = vsel %vm42_vm0, %v40_v2, 0.0  ;;  %v46_v5 = vsel %vm42_vm0, %v41_v3, 0.0  ;;  %p141_p2 = scmp.ne.s32.totalorder %s74_s7, %s140_s8  ;;  %p146_p4 = scmp.lt.s32.totalorder %s140_s8, %s140_s8 }
  0x2b   :  { %44 = vadd.xlane.f32.xlu0 %v43_v4 }
  0x2c   :  { %p147_p5 = por %p146_p4, %p145_p3 }
  0x2e   :  { %p148_p6 = pnand %p147_p5, %p141_p2 }
  0x2f   :  { %47 = vadd.xlane.f32.xlu0 %v46_v5 }
  0xb8   :  { %v45_v6 = vpop.xlane.xlu0 %44 }
  0xb9   :  { %v49_v7 = vmul.f32 0.03125, %v45_v6 }
  0xbb   :  { %v51_v8 = vadd.f32 1e-06, %v49_v7 }
  0xbc   :  { %v48_v9 = vpop.xlane.xlu0 %47 }
  0xbd   :  { %92 = vrsqrt.f32 %v51_v8  ;;  %v50_v10 = vmul.f32 0.03125, %v48_v9 }
  0xbf   :  { %v52_v11 = vadd.f32 1e-06, %v50_v10 }
  0xc1   :  { %94 = vrsqrt.f32 %v52_v11 }
  0xc7   :  { %v93_v12 = vpop.eup %92 }
  0xc8   :  { %v55_v14 = vmul.f32 %v93_v12, %v38_v0 }
  0xca   :  { %v64_v15 = vmul.f32 %v86_v13, %v55_v14 }
  0xcb   :  { %v95_v16 = vpop.eup %94 }
  0xcc   :  { %v56_v17 = vmul.f32 %v95_v16, %v39_v1  ;;  %66 = vst.msk [vmem:[#allocation7] sm:$0xff] %vm42_vm0, %v64_v15 }
  0xce   :  { %v65_v18 = vmul.f32 %v86_v13, %v56_v17 }
  0xd0   :  { %67 = vst.msk [vmem:[#allocation7 + $0x8] sm:$0xff] %vm42_vm0, %v65_v18 }
  0xd1   :  { %151 = shalt.err (!%p148_p6)
}
  0xd2   :  { %s152_s11 = scalar_lea.hbm %s236_s2, 256 }
  0xd3   :  { %p153_p7 = scmp.ne.s32.totalorder %s236_s2, %s152_s11  ;;  %p156_p8 = scmp.lt.u32.totalorder %s152_s11, %s236_s2 }
  0xd5   :  { %p158_p9 = pnand %p156_p8, %p153_p7 }
  0xd7   :  { %161 = shalt.err (!%p158_p9)
}
  0xd8   :  { %79 = dma.vmem_to_hbm [thread:$0]  %s74_s7, 256, %s236_s2, [#allocation4], %s169_s19, %s169_s19, %s170_s20  }
  0xd9   :  { %166 = dma.done.wait [#allocation4], 256  }
  0xda   :  { %167 = vsyncadd [#allocation4], 4294967040 }
  0xdb   :  { %83 = vsyncpa [#allocation3], 1 }
  0xdc   :  { %84 = vsyncpa [#allocation6], 1 }
  0xdd   :  { %85 = vsyncpa [#allocation4], 1 }

</bundles_post_ra>
